<compile_context>
chip_gen: v7x
topology: tpu7x:2x2x1
jax: 0.10.0
libtpu: 0.0.40
codegen_flags: <defaults>
</compile_context>

<pallas_src>
import functools

import jax
import jax.numpy as jnp
from jax import lax
from jax.experimental import pallas as pl
from jax.experimental.pallas import tpu as pltpu


def _round_up(n, m):
    return (n + m - 1) // m * m


def _sublane_multiple(dtype):
    # second-to-last-dim alignment for this dtype's vreg packing
    itemsize = jnp.dtype(dtype).itemsize
    return max(8, 32 // itemsize)


def _pick_tile(dim, max_tile, align):
    """Largest tile <= max_tile (multiple of `align`) with minimal padding."""
    padded = _round_up(dim, align)
    max_tile = max(align, _round_up(min(max_tile, padded), align))
    steps = -(-padded // max_tile)
    return _round_up(-(-padded // steps), align)


def _fcnorm_kernel(x_ref, w_ref, sx_ref, iw_ref, o_ref, acc_ref, *, feed_bf16):
    # x_ref: (TB, TF)   w_ref: (TC, TF)   sx_ref: (TB, 1)   iw_ref: (1, TC)
    # o_ref: (TB, TC)   acc_ref: (TB, TC) f32
    k = pl.program_id(2)

    @pl.when(k == 0)
    def _init():
        acc_ref[...] = jnp.zeros_like(acc_ref)

    x = x_ref[...]
    w = w_ref[...]
    if feed_bf16:
        x = x.astype(jnp.bfloat16)
        w = w.astype(jnp.bfloat16)

    # Raw (un-normalized) logits accumulated in f32 on the MXU.
    # Contracting the last dim of both operands == x @ w.T with no transpose.
    acc_ref[...] += lax.dot_general(
        x, w,
        dimension_numbers=(((1,), (1,)), ((), ())),
        preferred_element_type=jnp.float32)

    @pl.when(k == pl.num_programs(2) - 1)
    def _finalize():
        # sx = beta / max(||x_row||, eps), iw = 1 / max(||w_row||, eps);
        # precomputed once in the wrapper, consumed only here.
        o_ref[...] = (acc_ref[...] * sx_ref[...] * iw_ref[...]).astype(o_ref.dtype)


def fcnorm(x, weight, beta=10.0, *, tb=512, tc=512, tf=1024, feed_bf16=False):
    """out = beta * normalize(x) @ normalize(weight).T  (tiled Pallas TPU kernel)."""
    B, F = x.shape
    C, F2 = weight.shape
    assert F == F2, "feature dims must match"
    out_dtype = x.dtype

    # Deferred normalization: per-row inverse norms computed ONCE here (tiny
    # (B,1)/(1,C) f32 arrays), not per grid step inside the kernel.
    eps2 = jnp.float32(1e-12) * jnp.float32(1e-12)   # F.normalize eps, squared
    x32 = x.astype(jnp.float32)
    w32 = weight.astype(jnp.float32)
    sx = jnp.float32(beta) * lax.rsqrt(
        jnp.maximum(jnp.sum(x32 * x32, axis=1, keepdims=True), eps2))      # (B, 1)
    iw = lax.rsqrt(
        jnp.maximum(jnp.sum(w32 * w32, axis=1), eps2))[None, :]            # (1, C)

    # Tile selection: lane-dense output (tc multiple of 128), sublane-aligned
    # tb, tf multiple of 128; balanced so padding waste stays small.
    tb = _pick_tile(B, tb, _sublane_multiple(x.dtype))
    tc = _pick_tile(C, tc, 128)
    tf = _pick_tile(F, tf, 128)

    # Megacore (v7x): if both parallel axes collapse to a single block, split
    # the class axis so both TensorCores get work (harmless on v5e/v6e).
    if _round_up(B, tb) == tb and _round_up(C, tc) == tc and tc >= 256:
        tc = _round_up(tc // 2, 128)

    Bp, Cp, Fp = _round_up(B, tb), _round_up(C, tc), _round_up(F, tf)

    # TODO(synk): mask tail tiles in-kernel (broadcasted_iota + where) instead
    # of zero-padding large operands through HBM when dims aren't multiples.
    xp = x if (Bp == B and Fp == F) else jnp.pad(x, ((0, Bp - B), (0, Fp - F)))
    wp = weight if (Cp == C and Fp == F) else jnp.pad(
        weight, ((0, Cp - C), (0, Fp - F)))
    sxp = sx if Bp == B else jnp.pad(sx, ((0, Bp - B), (0, 0)))
    iwp = iw if Cp == C else jnp.pad(iw, ((0, 0), (0, Cp - C)))

    grid = (Bp // tb, Cp // tc, Fp // tf)

    # Scoped-VMEM limit sized from the actual tile footprint (double-buffered
    # operand/output tiles + f32 accumulator), capped so it is safe on v7x.
    in_sz = jnp.dtype(x.dtype).itemsize
    out_sz = jnp.dtype(out_dtype).itemsize
    vmem_bytes = (2 * (tb + tc) * tf * in_sz       # double-buffered x / w tiles
                  + 2 * tb * tc * out_sz           # double-buffered out tile
                  + tb * tc * 4                    # f32 accumulator scratch
                  + 4 * (tb + tc) * 4)             # inv-norm vectors
    vmem_limit = min(64 * 1024 * 1024,
                     max(32 * 1024 * 1024, int(1.5 * vmem_bytes)))

    out = pl.pallas_call(
        functools.partial(_fcnorm_kernel, feed_bf16=bool(feed_bf16)),
        out_shape=jax.ShapeDtypeStruct((Bp, Cp), out_dtype),
        grid_spec=pltpu.PrefetchScalarGridSpec(
            num_scalar_prefetch=0,
            grid=grid,
            in_specs=[
                pl.BlockSpec((tb, tf), lambda i, j, k: (i, k)),
                pl.BlockSpec((tc, tf), lambda i, j, k: (j, k)),
                pl.BlockSpec((tb, 1), lambda i, j, k: (i, 0)),
                pl.BlockSpec((1, tc), lambda i, j, k: (0, j)),
            ],
            out_specs=pl.BlockSpec((tb, tc), lambda i, j, k: (i, j)),
            scratch_shapes=[
                pltpu.VMEM((tb, tc), jnp.float32),   # raw-dot accumulator
            ],
        ),
        compiler_params=pltpu.CompilerParams(
            dimension_semantics=("parallel", "parallel", "arbitrary"),
            vmem_limit_bytes=vmem_limit),
    )(xp, wp, sxp, iwp)

    return out[:B, :C]


def init_fcnorm_weight(key, num_classes, num_features):
    """Replicates: uniform_(-1, 1).renorm_(2, 1, 1e-5).mul_(1e5)."""
    w = jax.random.uniform(key, (num_classes, num_features),
                           dtype=jnp.float32, minval=-1.0, maxval=1.0)
    # renorm_(p=2, dim=1, maxnorm=1e-5): each slice along dim 1 (columns here)
    # rescaled so its L2 norm is at most maxnorm.
    maxnorm = 1e-5
    col_norm = jnp.sqrt(jnp.sum(w * w, axis=0, keepdims=True))
    scale = jnp.where(col_norm > maxnorm, maxnorm / (col_norm + 1e-7), 1.0)
    return w * scale * 1e5


def _reference(x, weight, beta):
    xn = x / jnp.maximum(jnp.linalg.norm(x, axis=1, keepdims=True), 1e-12)
    wn = weight / jnp.maximum(jnp.linalg.norm(weight, axis=1, keepdims=True), 1e-12)
    return beta * (xn @ wn.T)


if __name__ == "__main__":
    key = jax.random.PRNGKey(0)
    k_x, k_w, k_x2, k_w2 = jax.random.split(key, 4)

    # Small shapes matching the module spec.
    batch, num_features, num_classes, beta = 4, 32, 8, 10.0
    x = jax.random.normal(k_x, (batch, num_features), dtype=jnp.float32)
    weight = init_fcnorm_weight(k_w, num_classes, num_features)

    out = jax.block_until_ready(fcnorm(x, weight, beta=beta))
    ref = _reference(x, weight, beta)
    assert out.shape == (batch, num_classes)
    assert jnp.allclose(out, ref, atol=2e-3, rtol=2e-3), \
        float(jnp.max(jnp.abs(out - ref)))

    # Larger shape exercising the (B, C, F) grid, accumulation and padding.
    B2, F2, C2 = 300, 1200, 700
    x2 = jax.random.normal(k_x2, (B2, F2), dtype=jnp.float32)
    w2 = jax.random.normal(k_w2, (C2, F2), dtype=jnp.float32)
    out2 = jax.block_until_ready(fcnorm(x2, w2, beta=beta))
    ref2 = _reference(x2, w2, beta)
    assert out2.shape == (B2, C2)
    assert float(jnp.max(jnp.abs(out2 - ref2))) < 1e-2

    # Optional fast path: bf16-fed MXU with f32 accumulation (looser numerics).
    out3 = jax.block_until_ready(fcnorm(x2, w2, beta=beta, feed_bf16=True))
    assert out3.shape == (B2, C2)
    assert bool(jnp.all(jnp.isfinite(out3)))
    assert float(jnp.max(jnp.abs(out3 - ref2))) < 1e-1

    print("KERNEL_OK")
</pallas_src>

<mosaic_0001>
module attributes {stable_mosaic.version = 11 : i64} {
  func.func @_fcnorm_kernel(%arg0: i32, %arg1: i32, %arg2: i32, %arg3: memref<8x128xf32, #tpu.memory_space<vmem>>, %arg4: memref<128x128xf32, #tpu.memory_space<vmem>>, %arg5: memref<8x1xf32, #tpu.memory_space<vmem>>, %arg6: memref<1x128xf32, #tpu.memory_space<vmem>>, %arg7: memref<8x128xf32, #tpu.memory_space<vmem>>, %arg8: memref<8x128xf32, #tpu.memory_space<vmem>>) attributes {dimension_semantics = [#tpu.dimension_semantics<parallel>, #tpu.dimension_semantics<parallel>, #tpu.dimension_semantics<arbitrary>], iteration_bounds = array<i64: 1, 1, 1>, scalar_prefetch = 0 : i64, scratch_operands = 1 : i64, tpu.core_type = #tpu.core_type<tc>, window_params = [{transform_indices = @transform_0, window_bounds = array<i64: 8, 128>}, {transform_indices = @transform_1, window_bounds = array<i64: 128, 128>}, {transform_indices = @transform_2, window_bounds = array<i64: 8, 1>}, {transform_indices = @transform_3, window_bounds = array<i64: 1, 128>}, {transform_indices = @transform_4, window_bounds = array<i64: 8, 128>}]} {
    %c0_i32 = arith.constant 0 : i32
    %0 = arith.cmpi eq, %arg2, %c0_i32 : i32
    %1 = arith.extui %0 : i1 to i32
    %c0_i32_0 = arith.constant 0 : i32
    %2 = arith.cmpi ne, %1, %c0_i32_0 : i32
    scf.if %2 {
      %cst_10 = arith.constant 0.000000e+00 : f32
      %12 = vector.broadcast %cst_10 : f32 to vector<8x128xf32>
      %c0_11 = arith.constant 0 : index
      %c0_12 = arith.constant 0 : index
      %13 = vector.load %arg8[%c0_11, %c0_12] : memref<8x128xf32, #tpu.memory_space<vmem>>, vector<8x128xf32>
      tpu.vector_store %arg8[%c0_11, %c0_12], %12 {strides = array<i32>} : memref<8x128xf32, #tpu.memory_space<vmem>>, vector<8x128xf32>,
    } else {
    }
    %c0 = arith.constant 0 : index
    %c0_1 = arith.constant 0 : index
    %3 = vector.load %arg3[%c0, %c0_1] : memref<8x128xf32, #tpu.memory_space<vmem>>, vector<8x128xf32>
    %c0_2 = arith.constant 0 : index
    %c0_3 = arith.constant 0 : index
    %4 = vector.load %arg4[%c0_2, %c0_3] : memref<128x128xf32, #tpu.memory_space<vmem>>, vector<128x128xf32>
    %c0_4 = arith.constant 0 : index
    %c0_5 = arith.constant 0 : index
    %5 = vector.load %arg8[%c0_4, %c0_5] : memref<8x128xf32, #tpu.memory_space<vmem>>, vector<8x128xf32>
    %cst = arith.constant dense<0.000000e+00> : vector<8x128xf32>
    %6 = tpu.matmul %3, %4, %cst {dimension_numbers = #tpu.dot_dimension_numbers<[1], [1], [0], [0], [0, 0, 1, 0], [], []>} : vector<8x128xf32>, vector<128x128xf32>, vector<8x128xf32> -> vector<8x128xf32>
    %7 = arith.addf %5, %6 : vector<8x128xf32>
    %c0_6 = arith.constant 0 : index
    %c0_7 = arith.constant 0 : index
    %8 = vector.load %arg8[%c0_6, %c0_7] : memref<8x128xf32, #tpu.memory_space<vmem>>, vector<8x128xf32>
    tpu.vector_store %arg8[%c0_6, %c0_7], %7 {strides = array<i32>} : memref<8x128xf32, #tpu.memory_space<vmem>>, vector<8x128xf32>,
    %c0_i32_8 = arith.constant 0 : i32
    %9 = arith.cmpi eq, %arg2, %c0_i32_8 : i32
    %10 = arith.extui %9 : i1 to i32
    %c0_i32_9 = arith.constant 0 : i32
    %11 = arith.cmpi ne, %10, %c0_i32_9 : i32
    scf.if %11 {
      %c0_10 = arith.constant 0 : index
      %c0_11 = arith.constant 0 : index
      %12 = vector.load %arg8[%c0_10, %c0_11] : memref<8x128xf32, #tpu.memory_space<vmem>>, vector<8x128xf32>
      %c0_12 = arith.constant 0 : index
      %c0_13 = arith.constant 0 : index
      %13 = vector.load %arg5[%c0_12, %c0_13] : memref<8x1xf32, #tpu.memory_space<vmem>>, vector<8x1xf32>
      %14 = vector.broadcast %13 : vector<8x1xf32> to vector<8x128xf32>
      %15 = arith.mulf %12, %14 : vector<8x128xf32>
      %c0_14 = arith.constant 0 : index
      %c0_15 = arith.constant 0 : index
      %16 = vector.load %arg6[%c0_14, %c0_15] : memref<1x128xf32, #tpu.memory_space<vmem>>, vector<1x128xf32>
      %17 = vector.broadcast %16 : vector<1x128xf32> to vector<8x128xf32>
      %18 = arith.mulf %15, %17 : vector<8x128xf32>
      %c0_16 = arith.constant 0 : index
      %c0_17 = arith.constant 0 : index
      %19 = vector.load %arg7[%c0_16, %c0_17] : memref<8x128xf32, #tpu.memory_space<vmem>>, vector<8x128xf32>
      tpu.vector_store %arg7[%c0_16, %c0_17], %18 {strides = array<i32>} : memref<8x128xf32, #tpu.memory_space<vmem>>, vector<8x128xf32>,
    } else {
    }
    return
  }
  func.func @transform_0(%arg0: i32, %arg1: i32, %arg2: i32) -> (i32, i32) {
    %c0_i32 = arith.constant 0 : i32
    return %arg0, %arg2 : i32, i32
  }
  func.func @transform_1(%arg0: i32, %arg1: i32, %arg2: i32) -> (i32, i32) {
    %c0_i32 = arith.constant 0 : i32
    return %arg1, %arg2 : i32, i32
  }
  func.func @transform_2(%arg0: i32, %arg1: i32, %arg2: i32) -> (i32, i32) {
    %c0_i32 = arith.constant 0 : i32
    %c0_i32_0 = arith.constant 0 : i32
    return %arg0, %c0_i32 : i32, i32
  }
  func.func @transform_3(%arg0: i32, %arg1: i32, %arg2: i32) -> (i32, i32) {
    %c0_i32 = arith.constant 0 : i32
    %c0_i32_0 = arith.constant 0 : i32
    return %c0_i32, %arg1 : i32, i32
  }
  func.func @transform_4(%arg0: i32, %arg1: i32, %arg2: i32) -> (i32, i32) {
    %c0_i32 = arith.constant 0 : i32
    return %arg0, %arg1 : i32, i32
  }
}

</mosaic_0001>

<bundles_post_ra>
// kernel: tpu_custom_call.1
= control target key start
LH: loop header
LB: loop body
LE: loop exit
PB: predicated region body
PF: predicated region fallthrough
CT: control target
= control target key end

     0   :  { %9 = vsyncpa [#allocation4], 0  ;;  %s362_s0 = inlined_call_operand.vmem [shape: f32[8,128], index: 0, kind: input, shape index: {}]   ;;  %s363_s1 = inlined_call_operand.hbm [shape: f32[128,128], index: 1, kind: input, shape index: {}]   ;;  %s364_s2 = inlined_call_operand.vmem [shape: f32[8,1], index: 2, kind: input, shape index: {}]   ;;  %s365_s3 = inlined_call_operand.vmem [shape: f32[1,128], index: 3, kind: input, shape index: {}]   ;;  %s366_s4 = inlined_call_operand.hbm [shape: f32[8,128], index: 4, kind: output, shape index: {}]  }
   0x1   :  { %10 = vsyncpa [#allocation5], 0  ;;  %s296_s15 = smov [#allocation3]   ;;  %s248_s19 = scalar_lea.hbm %s363_s1, 2048 }
   0x2   :  { %s18_s16 = sshll.u32 %s296_s15, 4  ;;  %p249_p0 = scmp.ne.s32.totalorder %s363_s1, %s248_s19  ;;  %s19_s16 = int_to_ptr.vmem [resolvable:$true] %s18_s16 }
   0x3   :  { %p252_p1 = scmp.lt.u32.totalorder %s248_s19, %s363_s1 }
   0x5   :  { %p254_p2 = pnand %p252_p1, %p249_p0 }
   0x7   :  { %257 = shalt.err (!%p254_p2)
}
   0x8   :  { %s258_s24 = scalar_lea.vmem %s19_s16, 2048  ;;  %p263_p4 = scmp.lt.s32.totalorder %s19_s16, %s19_s16 }
   0x9   :  { %p259_p3 = scmp.ne.s32.totalorder %s19_s16, %s258_s24  ;;  %p264_p5 = scmp.lt.s32.totalorder %s258_s24, %s258_s24 }
   0xb   :  { %p265_p6 = por %p264_p5, %p263_p4 }
   0xd   :  { %p266_p7 = pnand %p265_p6, %p259_p3 }
   0xf   :  { %269 = shalt.err (!%p266_p7)
}
  0x10   :  { %s297_s25 = smov 128   ;;  %s298_s26 = smov 8  }
  0x11   :  { %24 = dma.hbm_to_vmem [thread:$0]  %s363_s1, 2048, %s19_s16, [#allocation4], %s297_s25, %s297_s25, %s298_s26  }
  0x12   :  { %292 = dma.done.wait [#allocation4], 2048  }
  0x13   :  { %293 = vsyncadd [#allocation4], 4294965248  ;;  %v299_v0 = vmov 0.0|0.0   ;;  %vm300_vm0 = vmmov 0   ;;  %v301_v1 = vmov 0.0   ;;  %v302_v2 = vmov 0  }
  0x14   :  { %215 = vmatprep.subr.bf16.mxu0 %v299_v0  ;;  %212 = vmatprep.mubr.msk.f32.mxu0 %vm300_vm0, %v301_v1  ;;  %v38_v3 = vld [vmem:[#allocation3] sm:$0xff]  ;;  %v39_v4 = vld [vmem:[#allocation3 + $0x8] sm:$0xff]  ;;  %v40_v6 = vld [vmem:[#allocation3 + $0x10] sm:$0xff]  ;;  %s303_s7 = smov [#allocation6]  }
  0x15   :  { %247 = vset.pattern.permute.xlu0 %v302_v2  ;;  %v216_v5 = vpack.c.bf16 %v39_v4, %v38_v3  ;;  %v41_v7 = vld [vmem:[#allocation3 + $0x18] sm:$0xff]  ;;  %v131_v8 = vld [vmem:[%s364_s2] sm:$0xff]  ;;  %v43_v11 = vld [vmem:[#allocation3 + $0x28] sm:$0xff]  ;;  %s153_s8 = sshll.u32 %s303_s7, 4  ;;  %s154_s8 = int_to_ptr.vmem [resolvable:$true] %s153_s8 }
  0x16   :  { %134 = vperm.xlu0 %247, %v131_v8   ;;  %v219_v9 = vpack.c.bf16 %v41_v7, %v40_v6  ;;  %v42_v10 = vld [vmem:[#allocation3 + $0x20] sm:$0xff]  ;;  %v44_v13 = vld [vmem:[#allocation3 + $0x30] sm:$0xff]  ;;  %v45_v14 = vld [vmem:[#allocation3 + $0x38] sm:$0xff]  ;;  %s270_s9 = scalar_lea.vmem %s154_s8, 128  ;;  %p275_p9 = scmp.lt.s32.totalorder %s154_s8, %s154_s8 }
  0x17   :  { %217 = vmatpush3.bf16.xpose.msra.mxu0 %v216_v5  ;;  %v222_v12 = vpack.c.bf16 %v43_v11, %v42_v10  ;;  %v225_v15 = vpack.c.bf16 %v45_v14, %v44_v13  ;;  %v46_v16 = vld [vmem:[#allocation3 + $0x40] sm:$0xff]  ;;  %v47_v17 = vld [vmem:[#allocation3 + $0x48] sm:$0xff]  ;;  %v48_v19 = vld [vmem:[#allocation3 + $0x50] sm:$0xff]  ;;  %p271_p8 = scmp.ne.s32.totalorder %s154_s8, %s270_s9  ;;  %p276_p10 = scmp.lt.s32.totalorder %s270_s9, %s270_s9 }
  0x18   :  { %218 = vmatprep.subr.bf16.mxu0 %v299_v0  ;;  %v228_v18 = vpack.c.bf16 %v47_v17, %v46_v16  ;;  %v49_v20 = vld [vmem:[#allocation3 + $0x58] sm:$0xff]  ;;  %v50_v22 = vld [vmem:[#allocation3 + $0x60] sm:$0xff]  ;;  %v51_v23 = vld [vmem:[#allocation3 + $0x68] sm:$0xff] }
  0x19   :  { %v231_v21 = vpack.c.bf16 %v49_v20, %v48_v19  ;;  %v234_v24 = vpack.c.bf16 %v51_v23, %v50_v22  ;;  %v52_v25 = vld [vmem:[#allocation3 + $0x70] sm:$0xff]  ;;  %v53_v26 = vld [vmem:[#allocation3 + $0x78] sm:$0xff]  ;;  %v37_v28 = vld [vmem:[%s362_s0] sm:$0xff]  ;;  %p277_p11 = por %p276_p10, %p275_p9 }
  0x1a   :  { %v237_v27 = vpack.c.bf16 %v53_v26, %v52_v25  ;;  %v162_v31 = vld [vmem:[%s365_s3] ss:$0 sm:$0xff] }
  0x1b   :  { %p278_p12 = pnand %p277_p11, %p271_p8 }
  0x1f   :  { %220 = vmatpush3.bf16.xpose.msra.mxu0 %v219_v9 }
  0x20   :  { %221 = vmatprep.subr.bf16.mxu0 %v299_v0 }
  0x27   :  { %223 = vmatpush3.bf16.xpose.msra.mxu0 %v222_v12 }
  0x28   :  { %224 = vmatprep.subr.bf16.mxu0 %v299_v0 }
  0x2f   :  { %226 = vmatpush3.bf16.xpose.msra.mxu0 %v225_v15 }
  0x30   :  { %227 = vmatprep.subr.bf16.mxu0 %v299_v0 }
  0x37   :  { %229 = vmatpush3.bf16.xpose.msra.mxu0 %v228_v18 }
  0x38   :  { %230 = vmatprep.subr.bf16.mxu0 %v299_v0 }
  0x3f   :  { %232 = vmatpush3.bf16.xpose.msra.mxu0 %v231_v21 }
  0x40   :  { %233 = vmatprep.subr.bf16.mxu0 %v299_v0 }
  0x47   :  { %235 = vmatpush3.bf16.xpose.msra.mxu0 %v234_v24 }
  0x48   :  { %236 = vmatprep.subr.bf16.mxu0 %v299_v0 }
  0x4f   :  { %238 = vmatpush3.bf16.xpose.msra.mxu0 %v237_v27 }
  0x56   :  { %213 = vmatmul.mubr.f32.vlgmr.msra.gmra.mrb[0].mxu0 %v37_v28 }
  0x95   :  { %v135_v29 = vpop.permute.xlu0 %134 }
 0x129   :  { %v121_v30 = vpop.f32.mrb[0].mxu0 }
 0x12a   :  { %v137_v32 = vmul.f32 %v135_v29, %v121_v30  ;;  %v214_v33 = vpop.f32.mrb[1].mxu0 }
 0x12c   :  { %v145_v34 = vmul.f32 %v162_v31, %v137_v32 }
 0x12e   :  { %146 = vst [vmem:[#allocation6] sm:$0xff] %v145_v34 }
 0x12f   :  { %281 = shalt.err (!%p278_p12)
}
 0x130   :  { %s282_s11 = scalar_lea.hbm %s366_s4, 128 }
 0x131   :  { %p283_p13 = scmp.ne.s32.totalorder %s366_s4, %s282_s11  ;;  %p286_p0 = scmp.lt.u32.totalorder %s282_s11, %s366_s4 }
 0x133   :  { %p288_p1 = pnand %p286_p0, %p283_p13 }
 0x135   :  { %291 = shalt.err (!%p288_p1)
}
 0x136   :  { %156 = dma.vmem_to_hbm [thread:$0]  %s154_s8, 128, %s366_s4, [#allocation5]  }
 0x137   :  { %294 = dma.done.wait [#allocation5], 128  }
 0x138   :  { %295 = vsyncadd [#allocation5], 4294967168 }
 0x139   :  { %160 = vsyncpa [#allocation4], 1 }
 0x13a   :  { %161 = vsyncpa [#allocation5], 1 }

</bundles_post_ra>
